<compile_context>
chip_gen: v6e
topology: v6e:2x2x1
jax: 0.10.0
libtpu: 0.0.40
codegen_flags: <defaults>
</compile_context>

<pallas_src>
import functools

import numpy as np
import jax
import jax.numpy as jnp
from jax.experimental import pallas as pl
from jax.experimental.pallas import tpu as pltpu

NEG_INF = -1.0e30   # finite sentinel: avoids inf-inf -> NaN in log-space math
_BIG = 1.0e29       # zero_infinity threshold
_B = 8              # samples per grid step (fills the 8 f32 sublanes of a vreg)

_ROLL_SHIFT_CACHE = {}


def _right_shift_amounts(s_pad):
    """Static pltpu.roll amounts implementing y[s] = x[s-1] and y[s] = x[s-2].

    Probes the hardware lowering once (cached) so the main kernel is correct
    regardless of the rotate-direction convention."""
    if s_pad in _ROLL_SHIFT_CACHE:
        return _ROLL_SHIFT_CACHE[s_pad]

    def probe_kernel(x_ref, o_ref):
        o_ref[...] = pltpu.roll(x_ref[...], 1, axis=1)

    x = jnp.arange(s_pad, dtype=jnp.float32).reshape(1, s_pad)
    y = pl.pallas_call(
        probe_kernel,
        out_shape=jax.ShapeDtypeStruct((1, s_pad), jnp.float32),
    )(x)
    v = int(np.asarray(y)[0, 0])
    if v == s_pad - 1:          # jnp.roll convention: y[s] = x[s-1]
        sh = (1, 2)
    elif v == 1:                # opposite convention: y[s] = x[s+1]
        sh = (s_pad - 1, s_pad - 2)
    else:
        raise RuntimeError(f"unexpected pltpu.roll semantics (probe value {v})")
    _ROLL_SHIFT_CACHE[s_pad] = sh
    return sh


def ctc_focal_kernel(pred_len_ref, targ_len_ref,        # scalar prefetch (SMEM)
                     lp_ref, ext_ref, skip_add_ref,     # VMEM inputs
                     out_ref,                           # VMEM output block (B, 128)
                     lpext_ref,                         # VMEM scratch (B*T_pad, S_pad)
                     *, sh1, sh2):
    nb = pl.program_id(0)
    B, T_pad, C = lp_ref.shape
    S_pad = ext_ref.shape[1]

    # ---- gather log p(extended_symbol) for every (t, s) via one-hot matmul (MXU) ----
    # Scratch rows are sample-major: row b*T_pad + t <-> (sample b, time t); padded /
    # out-of-range extended columns select blank (id 0) which is harmless because the
    # recursion only looks left and the end reduction masks to s in {S-1, S-2}.
    c_iota = jax.lax.broadcasted_iota(jnp.int32, (C, S_pad), 0)
    for b in range(B):
        ids_b = ext_ref[pl.ds(b, 1), :]                         # (1, S_pad) int32
        oh_b = (c_iota == ids_b).astype(jnp.float32)            # (C, S_pad) one-hot
        lpext_ref[pl.ds(b * T_pad, T_pad), :] = jnp.dot(
            lp_ref[b], oh_b, preferred_element_type=jnp.float32)  # (T_pad, S_pad)

    # ---- hoisted, loop-invariant per-block data --------------------------------------
    s_idx = jax.lax.broadcasted_iota(jnp.int32, (1, S_pad), 1)
    row_ids = jax.lax.broadcasted_iota(jnp.int32, (B, 1), 0)
    base = nb * B
    tn_col = jnp.zeros((B, 1), jnp.int32)    # per-sample prediction length
    ln_col = jnp.zeros((B, 1), jnp.int32)    # per-sample target length
    for b in range(B):
        tn_col = jnp.where(row_ids == b, pred_len_ref[base + b], tn_col)
        ln_col = jnp.where(row_ids == b, targ_len_ref[base + b], ln_col)

    skip_add = skip_add_ref[...]                         # additive 0 / NEG_INF skip mask
    m1_add = jnp.where(s_idx < 1, NEG_INF, 0.0)          # kill the wrapped lane of shift-1

    # ---- init (t = 0): alpha0[s] = lpext[0, s] for s in {0, 1 (if L >= 1)} ------------
    lp0 = lpext_ref[pl.ds(0, B, stride=T_pad), :]        # (B, S_pad) row t=0 of each sample
    init_ok = (s_idx == 0) | ((s_idx == 1) & (ln_col >= 1))
    alpha = lp0 + jnp.where(init_ok, 0.0, NEG_INF)

    # ---- log-space forward recursion over time ----------------------------------------
    def body(t, alpha):
        lp_t = lpext_ref[pl.ds(t, B, stride=T_pad), :]   # (B, S_pad) row t of each sample
        a1 = pltpu.roll(alpha, sh1, axis=1) + m1_add     # alpha[s-1]
        a2 = pltpu.roll(alpha, sh2, axis=1) + skip_add   # alpha[s-2] on allowed skips
        mx = jnp.maximum(alpha, a1)
        mn = jnp.minimum(alpha, a1)
        hi = jnp.maximum(mx, a2)
        mid = jnp.minimum(mx, a2)
        # one of {alpha, a1, a2} equals hi -> 2 exps + 1 log on the EUP instead of 3 + 1
        lse = hi + jnp.log(1.0 + jnp.exp(mid - hi) + jnp.exp(mn - hi))
        new = lse + lp_t
        return jnp.where(t < tn_col, new, alpha)         # freeze samples past their Tn

    alpha = jax.lax.fori_loop(1, T_pad, body, alpha, unroll=2)

    # ---- terminal logsumexp over the last two extended states -------------------------
    s_last = 2 * ln_col                                  # = S - 1
    e1 = s_idx == s_last
    e2 = (s_idx == s_last - 1) & (ln_col >= 1)
    a_end1 = jnp.sum(jnp.where(e1, alpha, 0.0), axis=-1, keepdims=True)   # (B, 1)
    a_end2 = jnp.sum(jnp.where(e2, alpha, 0.0), axis=-1, keepdims=True)
    a_end2 = jnp.where(ln_col >= 1, a_end2, NEG_INF)
    hi = jnp.maximum(a_end1, a_end2)
    lo = jnp.minimum(a_end1, a_end2)
    loss = -(hi + jnp.log(1.0 + jnp.exp(lo - hi)))       # raw CTC loss per sample (B, 1)
    out_ref[...] = pl.broadcast_to(loss, out_ref.shape)


def _build_ext_ids(targets, target_lengths, s_pad):
    """Unpack flat targets and interleave blanks -> extended ids (N, s_pad) int32."""
    N = target_lengths.shape[0]
    L_max = (s_pad - 1) // 2
    offsets = jnp.concatenate(
        [jnp.zeros((1,), jnp.int32), jnp.cumsum(target_lengths)[:-1].astype(jnp.int32)])
    k = jnp.arange(L_max, dtype=jnp.int32)
    valid = k[None, :] < target_lengths[:, None]
    idx = jnp.where(valid, offsets[:, None] + k[None, :], 0)
    tgt = jnp.where(valid, targets[idx], 0)                        # (N, L_max)

    s = jnp.arange(s_pad, dtype=jnp.int32)
    is_odd = (s % 2) == 1
    kk = jnp.clip((s - 1) // 2, 0, L_max - 1)
    ext = jnp.where(is_odd[None, :], tgt[:, kk], 0)                # (N, s_pad)
    in_range = s[None, :] < (2 * target_lengths + 1)[:, None]
    ext = jnp.where(in_range, ext, 0).astype(jnp.int32)            # blank outside range
    return ext, in_range


def ctc_focal_loss(log_probs, targets, pred_lengths, target_lengths, s_pad=128):
    """CTC loss (blank=0, zero_infinity=True) + focal weighting + batch mean."""
    T, N, C = log_probs.shape
    targets = targets.astype(jnp.int32)
    target_lengths = target_lengths.astype(jnp.int32)
    pred_lengths = pred_lengths.astype(jnp.int32)

    # Guard: the extended-target axis must fit (2*max(L)+1 <= s_pad).
    needed = 2 * int(np.max(np.asarray(target_lengths))) + 1
    if needed > s_pad:
        s_pad = int(pl.cdiv(needed, 128)) * 128

    B = _B
    N_pad = int(pl.cdiv(N, B)) * B
    T_pad = int(pl.cdiv(T, 8)) * 8

    # (T, N, C) -> (N, T, C); pad batch to a multiple of 8 and T to a multiple of 8.
    lp = jnp.transpose(log_probs, (1, 0, 2)).astype(jnp.float32)
    lp = jnp.pad(lp, ((0, N_pad - N), (0, T_pad - T), (0, 0)))

    ext, in_range = _build_ext_ids(targets, target_lengths, s_pad)   # (N, s_pad) int32
    s_ar = jnp.arange(s_pad, dtype=jnp.int32)[None, :]
    ext_m2 = jnp.concatenate(
        [jnp.full((N, 2), -1, jnp.int32), ext[:, : s_pad - 2]], axis=1)
    skip_ok = (s_ar >= 2) & (ext != 0) & (ext != ext_m2) & in_range
    skip_add = jnp.where(skip_ok, 0.0, NEG_INF).astype(jnp.float32)

    ext = jnp.pad(ext, ((0, N_pad - N), (0, 0)))                      # blank-padded rows
    skip_add = jnp.pad(skip_add, ((0, N_pad - N), (0, 0)), constant_values=NEG_INF)
    tlen = jnp.pad(target_lengths, (0, N_pad - N))
    plen = jnp.pad(pred_lengths, (0, N_pad - N), constant_values=1)

    sh1, sh2 = _right_shift_amounts(s_pad)
    kernel = functools.partial(ctc_focal_kernel, sh1=sh1, sh2=sh2)

    grid_spec = pltpu.PrefetchScalarGridSpec(
        num_scalar_prefetch=2,
        grid=(N_pad // B,),
        in_specs=[
            pl.BlockSpec((B, T_pad, C), lambda nb, p, t: (nb, 0, 0)),
            pl.BlockSpec((B, s_pad), lambda nb, p, t: (nb, 0)),
            pl.BlockSpec((B, s_pad), lambda nb, p, t: (nb, 0)),
        ],
        out_specs=pl.BlockSpec((B, 128), lambda nb, p, t: (nb, 0)),
        scratch_shapes=[pltpu.VMEM((B * T_pad, s_pad), jnp.float32)],
    )
    cost = pl.CostEstimate(
        flops=2 * N_pad * T_pad * C * s_pad + 12 * N_pad * T_pad * s_pad,
        transcendentals=3 * N_pad * T_pad * s_pad,
        bytes_accessed=(lp.size + ext.size + skip_add.size + N_pad * 128) * 4,
    )
    out = pl.pallas_call(
        kernel,
        out_shape=jax.ShapeDtypeStruct((N_pad, 128), jnp.float32),
        grid_spec=grid_spec,
        compiler_params=pltpu.CompilerParams(
            dimension_semantics=("parallel",),
            vmem_limit_bytes=32 * 1024 * 1024,
        ),
        cost_estimate=cost,
    )(plen, tlen, lp, ext, skip_add)

    per = out[:N, 0]                               # raw per-sample CTC losses
    per = jnp.where(per > _BIG, 0.0, per)          # zero_infinity=True
    w = 1.0 - jnp.exp(-per)
    return jnp.mean(per * (w * w))                 # focal weighting + mean


def ctc_focal_ref(log_probs, targets, pred_lengths, target_lengths):
    """Pure-numpy reference (standard CTC forward algorithm + focal weighting)."""
    T, N, C = log_probs.shape
    losses = []
    off = 0
    for n in range(N):
        L = int(target_lengths[n]); Tn = int(pred_lengths[n])
        tgt = targets[off:off + L]; off += L
        ext = [0]
        for c in tgt:
            ext += [int(c), 0]
        S = len(ext)
        alpha = np.full((S,), -np.inf)
        alpha[0] = log_probs[0, n, ext[0]]
        if S > 1:
            alpha[1] = log_probs[0, n, ext[1]]
        for t in range(1, Tn):
            new = np.full((S,), -np.inf)
            for s in range(S):
                v = alpha[s]
                if s >= 1:
                    v = np.logaddexp(v, alpha[s - 1])
                if s >= 2 and ext[s] != 0 and ext[s] != ext[s - 2]:
                    v = np.logaddexp(v, alpha[s - 2])
                new[s] = v + log_probs[t, n, ext[s]]
            alpha = new
        ll = np.logaddexp(alpha[S - 1], alpha[S - 2] if S >= 2 else -np.inf)
        loss = -ll
        if not np.isfinite(loss):
            loss = 0.0
        losses.append(loss)
    losses = np.asarray(losses, dtype=np.float64)
    w = (1.0 - np.exp(-losses)) ** 2
    return float(np.mean(losses * w))


if __name__ == "__main__":
    key = jax.random.PRNGKey(0)
    T, N, C = 20, 4, 32
    k1, k2 = jax.random.split(key)

    logits = jax.random.normal(k1, (T, N, C), dtype=jnp.float32)
    log_probs = jax.nn.log_softmax(logits, axis=-1)            # (T, N, C)
    target_lengths = jnp.array([3, 5, 6, 2], dtype=jnp.int32)  # sum = 16
    pred_lengths = jnp.array([20, 18, 20, 15], dtype=jnp.int32)
    total = int(np.sum(np.asarray(target_lengths)))
    targets = jax.random.randint(k2, (total,), 1, C, dtype=jnp.int32)

    out = ctc_focal_loss(log_probs, targets, pred_lengths, target_lengths)
    out = jax.block_until_ready(out)

    ref = ctc_focal_ref(np.asarray(log_probs), np.asarray(targets),
                        np.asarray(pred_lengths), np.asarray(target_lengths))
    assert np.isfinite(float(out)), out
    assert abs(float(out) - ref) <= 2e-3 * max(1.0, abs(ref)), (float(out), ref)
    print("KERNEL_OK")
</pallas_src>

<mosaic_0001>
module attributes {stable_mosaic.version = 11 : i64} {
  func.func @probe_kernel(%arg0: memref<1x128xf32, #tpu.memory_space<vmem>>, %arg1: memref<1x128xf32, #tpu.memory_space<vmem>>) attributes {dimension_semantics = [], scalar_prefetch = 0 : i64, scratch_operands = 0 : i64, tpu.core_type = #tpu.core_type<tc>} {
    %c0 = arith.constant 0 : index
    %c0_0 = arith.constant 0 : index
    %0 = vector.load %arg0[%c0, %c0_0] : memref<1x128xf32, #tpu.memory_space<vmem>>, vector<1x128xf32>
    %c1_i32 = arith.constant 1 : i32
    %1 = tpu.dynamic_rotate %0 by %c1_i32 dim 1 : vector<1x128xf32>, i32 -> vector<1x128xf32>
    %c0_1 = arith.constant 0 : index
    %c0_2 = arith.constant 0 : index
    %2 = vector.load %arg1[%c0_1, %c0_2] : memref<1x128xf32, #tpu.memory_space<vmem>>, vector<1x128xf32>
    tpu.vector_store %arg1[%c0_1, %c0_2], %1 {strides = array<i32>} : memref<1x128xf32, #tpu.memory_space<vmem>>, vector<1x128xf32>,
    return
  }
}

</mosaic_0001>

<bundles_post_ra>
// kernel: tpu_custom_call.1
= control target key start
LH: loop header
LB: loop body
LE: loop exit
PB: predicated region body
PF: predicated region fallthrough
CT: control target
= control target key end

     0   :  { %6 = vsyncpa [#allocation3], 0  ;;  %s106_s0 = inlined_call_operand.hbm [shape: f32[1,128], index: 0, kind: input, shape index: {}]   ;;  %s107_s1 = inlined_call_operand.hbm [shape: f32[1,128], index: 1, kind: output, shape index: {}]  }
   0x1   :  { %7 = vsyncpa [#allocation4], 0  ;;  %s87_s6 = smov [#allocation2]  }
   0x2   :  { %s14_s7 = sshll.u32 %s87_s6, 4  ;;  %s15_s7 = int_to_ptr.vmem [resolvable:$true] %s14_s7 }
   0x3   :  { %s51_s8 = scalar_lea.vmem %s15_s7, 16  ;;  %s55_s9 = scalar_lea.vmem %s15_s7, 32 }
   0x4   :  { %p52_p0 = scmp.ne.s32.totalorder %s15_s7, %s51_s8  ;;  %p56_p1 = scmp.lt.s32.totalorder %s15_s7, %s15_s7 }
   0x5   :  { %p57_p2 = scmp.lt.s32.totalorder %s55_s9, %s51_s8 }
   0x7   :  { %p58_p3 = por %p57_p2, %p56_p1 }
   0x9   :  { %p59_p4 = pnand %p58_p3, %p52_p0 }
   0xb   :  { %62 = shalt.err (!%p59_p4)
}
   0xc   :  { %17 = dma.hbm_to_vmem [thread:$0]  %s106_s0, 16, %s15_s7, [#allocation3]  }
   0xd   :  { %83 = dma.done.wait [#allocation3], 16  }
   0xe   :  { %84 = vsyncadd [#allocation3], 4294967280  ;;  %v21_v0 = vld [vmem:[#allocation2] sm:$0x1]  ;;  %s88_s12 = smov 1   ;;  %s89_s13 = smov [#allocation5]  }
   0xf   :  { %22 = vrot.lane.b32.xlu0 %v21_v0, %s88_s12  ;;  %s31_s14 = sshll.u32 %s89_s13, 4  ;;  %s32_s14 = int_to_ptr.vmem [resolvable:$true] %s31_s14 }
  0x10   :  { %s63_s15 = scalar_lea.vmem %s32_s14, 16  ;;  %s67_s16 = scalar_lea.vmem %s32_s14, 32 }
  0x11   :  { %p64_p5 = scmp.ne.s32.totalorder %s32_s14, %s63_s15  ;;  %p68_p6 = scmp.lt.s32.totalorder %s32_s14, %s32_s14 }
  0x12   :  { %p69_p7 = scmp.lt.s32.totalorder %s67_s16, %s63_s15 }
  0x14   :  { %p70_p8 = por %p69_p7, %p68_p6 }
  0x16   :  { %p71_p9 = pnand %p70_p8, %p64_p5 }
  0x81   :  { %v23_v1 = vpop.permute.xlu0 %22 }
  0x82   :  { %24 = vst [vmem:[#allocation5] sm:$0x1] %v23_v1 }
  0x83   :  { %74 = shalt.err (!%p71_p9)
}
  0x84   :  { %34 = dma.vmem_to_hbm [thread:$0]  %s32_s14, 16, %s107_s1, [#allocation4]  }
  0x85   :  { %85 = dma.done.wait [#allocation4], 16  }
  0x86   :  { %86 = vsyncadd [#allocation4], 4294967280 }
  0x87   :  { %38 = vsyncpa [#allocation3], 1 }
  0x88   :  { %39 = vsyncpa [#allocation4], 1 }

</bundles_post_ra>
